<compile_context>
chip_gen: v7x
topology: tpu7x:2x2x1
jax: 0.10.0
libtpu: 0.0.40
codegen_flags: <defaults>
</compile_context>

<pallas_src>
import functools

import jax
import jax.numpy as jnp
from jax.experimental import pallas as pl
from jax.experimental.pallas import tpu as pltpu

GAMMA = 1.5
ALPHA = 0.25
LANES = 128
NUM_PARALLEL = 2  # leading "parallel" grid axis (uses both TCs on v7x)


def _round_up(x, n):
    return (x + n - 1) // n * n


def _qfocal_kernel(pred_ref, true_ref, out_ref, *, gamma, alpha):
    """One (tile_rows, 128) tile; accumulates per-core partial sums into an
    (8, 128) output block that stays resident across the reduction axis."""
    i = pl.program_id(1)

    @pl.when(i == 0)
    def _():
        out_ref[...] = jnp.zeros_like(out_ref)

    x = pred_ref[...].astype(jnp.float32)
    t = true_ref[...].astype(jnp.float32)

    # Shared transcendental: e = exp(-|x|)
    e = jnp.exp(-jnp.abs(x))

    # Numerically stable BCE-with-logits (reduction='none'):
    #   max(x, 0) - x*t + log(1 + exp(-|x|))
    bce = jnp.maximum(x, 0.0) - x * t + jnp.log1p(e)

    # sigmoid(x) reusing e: 1/(1+e) for x>=0, e/(1+e) for x<0.
    inv = 1.0 / (1.0 + e)
    pred_prob = jnp.where(x >= 0.0, inv, e * inv)

    # alpha_factor = t*alpha + (1-t)*(1-alpha) == (1-alpha) + t*(2*alpha - 1)
    alpha_factor = (1.0 - alpha) + t * (2.0 * alpha - 1.0)

    m = jnp.abs(t - pred_prob)
    if gamma == 1.5:
        modulating_factor = m * jnp.sqrt(m)  # m**1.5, one EUP sqrt
    else:
        modulating_factor = jnp.power(m, gamma)

    loss = bce * alpha_factor * modulating_factor  # (tile_rows, 128)

    # VPU-only partial reduction into a vreg-shaped accumulator.
    r = loss.shape[0]
    out_ref[...] += loss.reshape(r // 8, 8, LANES).sum(axis=0)


def qfocal_loss(pred, true, gamma=GAMMA, alpha=ALPHA, reduction="mean",
                tile_rows=1024):
    """QFocalLoss(BCEWithLogitsLoss(reduction='mean'), gamma, alpha)(pred, true)."""
    assert pred.shape == true.shape
    total = pred.size

    # ---- layout: flatten to lane-dense (rows, 128) and pad. ----------------
    m = pl.cdiv(total, LANES)                      # rows of real data
    rows_per_core = pl.cdiv(m, NUM_PARALLEL)
    tile_rows = min(tile_rows, _round_up(rows_per_core, 8))
    rows_padded = _round_up(max(m, 1), NUM_PARALLEL * tile_rows)
    steps = rows_padded // (NUM_PARALLEL * tile_rows)

    pad = rows_padded * LANES - total
    # pred=0, true=0.5 => |true - sigmoid(pred)| = 0 => zero loss contribution.
    pred2 = jnp.pad(pred.reshape(-1), (0, pad),
                    constant_values=0.0).reshape(rows_padded, LANES)
    true2 = jnp.pad(true.reshape(-1), (0, pad),
                    constant_values=0.5).reshape(rows_padded, LANES)

    kernel = functools.partial(_qfocal_kernel, gamma=gamma, alpha=alpha)

    partials = pl.pallas_call(
        kernel,
        out_shape=jax.ShapeDtypeStruct((NUM_PARALLEL * 8, LANES), jnp.float32),
        grid_spec=pltpu.PrefetchScalarGridSpec(
            num_scalar_prefetch=0,
            grid=(NUM_PARALLEL, steps),
            in_specs=[
                pl.BlockSpec((tile_rows, LANES),
                             lambda c, i: (c * steps + i, 0)),
                pl.BlockSpec((tile_rows, LANES),
                             lambda c, i: (c * steps + i, 0)),
            ],
            out_specs=pl.BlockSpec((8, LANES), lambda c, i: (c, 0)),
        ),
        compiler_params=pltpu.CompilerParams(
            dimension_semantics=("parallel", "arbitrary"),
        ),
    )(pred2, true2)

    total_sum = jnp.sum(partials)
    if reduction == "mean":
        return total_sum / float(total)
    elif reduction == "sum":
        return total_sum
    else:
        raise NotImplementedError("reduction='none' not fused in this kernel")


def qfocal_loss_ref(pred, true, gamma=GAMMA, alpha=ALPHA):
    x = pred.astype(jnp.float32)
    t = true.astype(jnp.float32)
    bce = jnp.maximum(x, 0.0) - x * t + jnp.log1p(jnp.exp(-jnp.abs(x)))
    p = jax.nn.sigmoid(x)
    af = t * alpha + (1.0 - t) * (1.0 - alpha)
    mf = jnp.power(jnp.abs(t - p), gamma)
    return jnp.mean(bce * af * mf)


if __name__ == "__main__":
    key = jax.random.PRNGKey(0)
    k1, k2 = jax.random.split(key)
    # Same semantics as a (2, 4, 16, 16) NCHW prediction map (elementwise loss).
    pred = jax.random.normal(k1, (2, 4, 16, 16), dtype=jnp.float32)
    true = jax.random.uniform(k2, (2, 4, 16, 16), dtype=jnp.float32)  # quality targets in [0,1]

    out = qfocal_loss(pred, true)
    out = jax.block_until_ready(out)

    ref = qfocal_loss_ref(pred, true)
    assert jnp.allclose(out, ref, rtol=1e-4, atol=1e-6), (out, ref)
    print("KERNEL_OK")
</pallas_src>

<mosaic_0001>
module attributes {stable_mosaic.version = 11 : i64} {
  func.func @_qfocal_kernel(%arg0: i32, %arg1: i32, %arg2: memref<8x128xf32, #tpu.memory_space<vmem>>, %arg3: memref<8x128xf32, #tpu.memory_space<vmem>>, %arg4: memref<8x128xf32, #tpu.memory_space<vmem>>) attributes {dimension_semantics = [#tpu.dimension_semantics<parallel>, #tpu.dimension_semantics<arbitrary>], iteration_bounds = array<i64: 2, 1>, scalar_prefetch = 0 : i64, scratch_operands = 0 : i64, tpu.core_type = #tpu.core_type<tc>, window_params = [{transform_indices = @transform_0, window_bounds = array<i64: 8, 128>}, {transform_indices = @transform_1, window_bounds = array<i64: 8, 128>}, {transform_indices = @transform_2, window_bounds = array<i64: 8, 128>}]} {
    %c0_i32 = arith.constant 0 : i32
    %0 = arith.cmpi eq, %arg1, %c0_i32 : i32
    %1 = arith.extui %0 : i1 to i32
    %c0_i32_0 = arith.constant 0 : i32
    %2 = arith.cmpi ne, %1, %c0_i32_0 : i32
    scf.if %2 {
      %cst_15 = arith.constant 0.000000e+00 : f32
      %38 = vector.broadcast %cst_15 : f32 to vector<8x128xf32>
      %c0_16 = arith.constant 0 : index
      %c0_17 = arith.constant 0 : index
      %39 = vector.load %arg4[%c0_16, %c0_17] : memref<8x128xf32, #tpu.memory_space<vmem>>, vector<8x128xf32>
      tpu.vector_store %arg4[%c0_16, %c0_17], %38 {strides = array<i32>} : memref<8x128xf32, #tpu.memory_space<vmem>>, vector<8x128xf32>,
    } else {
    }
    %c0 = arith.constant 0 : index
    %c0_1 = arith.constant 0 : index
    %3 = vector.load %arg2[%c0, %c0_1] : memref<8x128xf32, #tpu.memory_space<vmem>>, vector<8x128xf32>
    %c0_2 = arith.constant 0 : index
    %c0_3 = arith.constant 0 : index
    %4 = vector.load %arg3[%c0_2, %c0_3] : memref<8x128xf32, #tpu.memory_space<vmem>>, vector<8x128xf32>
    %5 = math.absf %3 : vector<8x128xf32>
    %cst = arith.constant 0.000000e+00 : f32
    %6 = vector.broadcast %cst : f32 to vector<8x128xf32>
    %7 = arith.subf %6, %5 : vector<8x128xf32>
    %8 = math.exp %7 : vector<8x128xf32>
    %cst_4 = arith.constant 0.000000e+00 : f32
    %9 = vector.broadcast %cst_4 : f32 to vector<8x128xf32>
    %10 = arith.maximumf %3, %9 : vector<8x128xf32>
    %11 = arith.mulf %3, %4 : vector<8x128xf32>
    %12 = arith.subf %10, %11 : vector<8x128xf32>
    %13 = math.log1p %8 : vector<8x128xf32>
    %14 = arith.addf %12, %13 : vector<8x128xf32>
    %cst_5 = arith.constant 1.000000e+00 : f32
    %15 = vector.broadcast %cst_5 : f32 to vector<8x128xf32>
    %16 = arith.addf %15, %8 : vector<8x128xf32>
    %cst_6 = arith.constant 1.000000e+00 : f32
    %17 = vector.broadcast %cst_6 : f32 to vector<8x128xf32>
    %18 = arith.divf %17, %16 : vector<8x128xf32>
    %cst_7 = arith.constant 0.000000e+00 : f32
    %19 = vector.broadcast %cst_7 : f32 to vector<8x128xf32>
    %20 = arith.cmpf oge, %3, %19 : vector<8x128xf32>
    %21 = arith.mulf %8, %18 : vector<8x128xf32>
    %22 = arith.select %20, %18, %21 : vector<8x128xi1>, vector<8x128xf32>
    %cst_8 = arith.constant -5.000000e-01 : f32
    %23 = vector.broadcast %cst_8 : f32 to vector<8x128xf32>
    %24 = arith.mulf %4, %23 : vector<8x128xf32>
    %cst_9 = arith.constant 7.500000e-01 : f32
    %25 = vector.broadcast %cst_9 : f32 to vector<8x128xf32>
    %26 = arith.addf %25, %24 : vector<8x128xf32>
    %27 = arith.subf %4, %22 : vector<8x128xf32>
    %28 = math.absf %27 : vector<8x128xf32>
    %29 = math.sqrt %28 : vector<8x128xf32>
    %30 = arith.mulf %28, %29 : vector<8x128xf32>
    %31 = arith.mulf %14, %26 : vector<8x128xf32>
    %32 = arith.mulf %31, %30 : vector<8x128xf32>
    %c0_10 = arith.constant 0 : index
    %c0_11 = arith.constant 0 : index
    %33 = vector.load %arg4[%c0_10, %c0_11] : memref<8x128xf32, #tpu.memory_space<vmem>>, vector<8x128xf32>
    %34 = vector.shape_cast %32 : vector<8x128xf32> to vector<1x8x128xf32>
    %cst_12 = arith.constant dense<0.000000e+00> : vector<8x128xf32>
    %35 = vector.multi_reduction <add>, %34, %cst_12 [0] : vector<1x8x128xf32> to vector<8x128xf32>
    %36 = arith.addf %33, %35 : vector<8x128xf32>
    %c0_13 = arith.constant 0 : index
    %c0_14 = arith.constant 0 : index
    %37 = vector.load %arg4[%c0_13, %c0_14] : memref<8x128xf32, #tpu.memory_space<vmem>>, vector<8x128xf32>
    tpu.vector_store %arg4[%c0_13, %c0_14], %36 {strides = array<i32>} : memref<8x128xf32, #tpu.memory_space<vmem>>, vector<8x128xf32>,
    return
  }
  func.func @transform_0(%arg0: i32, %arg1: i32) -> (i32, i32) {
    %c1_i32 = arith.constant 1 : i32
    %0 = arith.muli %arg0, %c1_i32 : i32
    %1 = arith.addi %0, %arg1 : i32
    %c0_i32 = arith.constant 0 : i32
    %c0_i32_0 = arith.constant 0 : i32
    return %1, %c0_i32 : i32, i32
  }
  func.func @transform_1(%arg0: i32, %arg1: i32) -> (i32, i32) {
    %c1_i32 = arith.constant 1 : i32
    %0 = arith.muli %arg0, %c1_i32 : i32
    %1 = arith.addi %0, %arg1 : i32
    %c0_i32 = arith.constant 0 : i32
    %c0_i32_0 = arith.constant 0 : i32
    return %1, %c0_i32 : i32, i32
  }
  func.func @transform_2(%arg0: i32, %arg1: i32) -> (i32, i32) {
    %c0_i32 = arith.constant 0 : i32
    %c0_i32_0 = arith.constant 0 : i32
    return %arg0, %c0_i32 : i32, i32
  }
}

</mosaic_0001>

<bundles_post_ra>
// kernel: tpu_custom_call.1
= control target key start
LH: loop header
LB: loop body
LE: loop exit
PB: predicated region body
PF: predicated region fallthrough
CT: control target
= control target key end

     0   :  { %7 = vsyncpa [#allocation3], 0  ;;  %s864_s0 = inlined_call_operand.hbm [shape: f32[16,128], index: 0, kind: input, shape index: {}]   ;;  %s865_s1 = inlined_call_operand.hbm [shape: f32[16,128], index: 1, kind: input, shape index: {}]   ;;  %s866_s2 = inlined_call_operand.hbm [shape: f32[16,128], index: 2, kind: output, shape index: {}]  }
   0x1   :  { %9 = vsyncpa [#allocation3 + $0x1], 0 }
   0x2   :  { %10 = vsyncpa [#allocation6], 0 }
   0x3   :  { %12 = vsyncpa [#allocation6 + $0x1], 0 }
   0x4   :  { %13 = vsyncpa [#allocation4], 0 }
   0x5   :  { %15 = vsyncpa [#allocation4 + $0x1], 0  ;;  %s639_s9 = smov 0   ;;  %s641_s10 = smov 0  }
   0x6   :  { %s643_s11 = smov 0   ;;  %s645_s12 = smov 0  }
   0x7   :  { %s647_s13 = smov 0   ;;  %s649_s14 = smov 0  }
   0x8 LB: > { %s381_s15 = sadd.s32 4294967295, %s619_s14   ;;  %s382_s16 = sadd.s32 4294967294, %s619_s14   ;;  %s619_s14 = sphi %s649_s14, %s21_s14   ;;  %s615_s13 = sphi %s647_s13, %s886_s13   ;;  %s611_s12 = sphi %s645_s12, %s885_s12   ;;  %s607_s11 = sphi %s643_s11, %s884_s11   ;;  %s603_s10 = sphi %s641_s10, %s883_s10   ;;  %s599_s9 = sphi %s639_s9, %s882_s9  }
   0x9   : > { %s33_s17 = sadd.s32 1, %s615_s13  ;;  %s42_s18 = sadd.s32 1, %s607_s11 }
   0xa   : > { %p35_p0 = scmp.ge.s32.totalorder %s33_s17, 2  ;;  %p49_p1 = scmp.ne.s32.totalorder %s607_s11, %s603_s10 }
   0xb   : > { %p50_p2 = scmp.eq.s32.totalorder %s619_s14, 0  ;;  %p55_p3 = scmp.ne.s32.totalorder %s603_s10, %s599_s9 }
   0xc   : > { %s888_s17 = smov (%p35_p0, %s33_s17), 0  ;;  %p56_p5 = scmp.eq.s32.totalorder %s381_s15, 0 }
   0xd   : > { %p680_p4 = por %p50_p2, %p49_p1  ;;  %s39_s20 = ssub.s32 %s615_s13, %s888_s17 }
   0xe   : > { %p107_p6 = scmp.eq.s32.totalorder %s381_s15, 1  ;;  %p40_p7 = scmp.eq.s32.totalorder %s39_s20, 0 }
   0xf   : > { %p686_p8 = por %p56_p5, %p55_p3  ;;  %p113_p10 = scmp.eq.s32.totalorder %s382_s16, 1 }
  0x10   : > { %p690_p9 = por %p107_p6, %p49_p1  ;;  %p414_p13 = scmp.lt.s32.totalorder %s619_s14, 2 }
  0x11   : > { %s870_s21 = scalar_select %p686_p8, 1, 0 }
  0x12   : > { %s871_s22 = scalar_select %p690_p9, 1, 0 }
  0x13   : > { %s695_s23 = scalar_select %p40_p7, %s607_s11, %s42_s18  }
  0x14   : > { %p697_p11 = por %p113_p10, %p55_p3  ;;  %s704_s25 = sand.u32 1, %s607_s11  }
  0x15   : > { %s385_s26 = sshll.u32 %s704_s25, 3  ;;  %s386_s27 = sshll.u32 %s615_s13, 7 }
  0x16   : > { %s872_s24 = scalar_select %p697_p11, 1, 0 }
  0x17   : > { %s713_s30 = scalar_lea.hbm %s864_s0, %s386_s27  ;;  %s137_s3 = scalar_lea.vmem [#allocation2], %s385_s26 }
  0x18   : > { %s145_s4 = sshll.u32 %s137_s3, 4  ;;  %p721_p0 = pnand %p414_p13, %p680_p4  ;;  %s717_s4 = int_to_ptr.vmem [resolvable:$true] %s145_s4 }
  0x19   : > { %s134_s6 = scalar_lea.sflag [#allocation3], %s704_s25  ;;  %s473_s7 = scalar_lea.hbm %s713_s30, 128 }
  0x1a   : > { %p474_p3 = scmp.ne.s32.totalorder %s713_s30, %s473_s7  ;;  %p475_p5 = pneg %p721_p0 }
  0x1b   : > { %s478_s16 = scalar_lea.hbm %s864_s0, 256  ;;  %p479_p4 = scmp.lt.u32.totalorder %s713_s30, %s864_s0 }
  0x1c   : > { %p476_p6 = pnand %p475_p5, %p474_p3  ;;  %p480_p10 = scmp.lt.u32.totalorder %s478_s16, %s473_s7 }
  0x1d   : > { %p482_p12 = scmp.lt.u32.totalorder %s473_s7, %s713_s30 }
  0x1e   : > { %p477_p7 = pneg %p476_p6  ;;  %p481_p13 = por %p480_p10, %p479_p4 }
  0x20   : > { %p483_p1 = por %p482_p12, %p481_p13 }
  0x22   : > { %p484_p2 = pnand %p483_p1, %p477_p7 }
  0x24   : > { %487 = shalt.err (!%p484_p2)
}
  0x25   : > { %s488_s20 = scalar_lea.vmem %s717_s4, 128  ;;  %s621_s28 = smov [#allocation2]  }
  0x26   : > { %p489_p3 = scmp.ne.s32.totalorder %s717_s4, %s488_s20  ;;  %s493_s29 = sshll.u32 %s621_s28, 4  ;;  %s494_s29 = int_to_ptr.vmem [resolvable:$false] %s493_s29 }
  0x27   : > { %s495_s3 = scalar_lea.vmem %s494_s29, 256  ;;  %p496_p9 = scmp.lt.s32.totalorder %s717_s4, %s494_s29 }
  0x28   : > { %p491_p6 = pnand %p489_p3, %p475_p5  ;;  %p497_p4 = scmp.lt.s32.totalorder %s495_s3, %s488_s20 }
  0x2a   : > { %p492_p11 = pneg %p491_p6  ;;  %p498_p10 = por %p497_p4, %p496_p9 }
  0x2c   : > { %p499_p12 = pnand %p498_p10, %p492_p11 }
  0x2e   : > { %502 = shalt.err (!%p499_p12)
}
  0x2f   : > { %406 = dma.hbm_to_vmem [thread:$0]  (!%p721_p0), %s713_s30, 128, %s717_s4, %s134_s6  }
  0x30   : > { %p874_p1 = scmp.lt.s32.totalorder %s619_s14, 3  ;;  %p875_p2 = scmp.ge.s32.totalorder %s619_s14, 1 }
  0x31   : > { %s766_s16 = scalar_lea.hbm %s865_s1, %s386_s27  ;;  %s156_s18 = scalar_lea.vmem [#allocation5], %s385_s26 }
  0x32   : > { %p757_p7 = pnand %p875_p2, %p874_p1  ;;  %s164_s19 = sshll.u32 %s156_s18, 4  ;;  %s165_s19 = int_to_ptr.vmem [resolvable:$true] %s164_s19 }
  0x33   : > { %s153_s30 = scalar_lea.sflag [#allocation6], %s704_s25  ;;  %s503_s4 = scalar_lea.hbm %s766_s16, 128 }
  0x34   : > { %s876_s7 = scalar_select %p757_p7, 1, 0 }
  0x35   : > { %p504_p9 = scmp.ne.s32.totalorder %s766_s16, %s503_s4  ;;  %s508_s27 = scalar_lea.hbm %s865_s1, 256 }
  0x36   : > { %p509_p3 = scmp.lt.u32.totalorder %s766_s16, %s865_s1  ;;  %p510_p6 = scmp.lt.u32.totalorder %s508_s27, %s503_s4 }
  0x37   : > { %p506_p11 = pnand %p504_p9, %p475_p5  ;;  %p512_p10 = scmp.lt.u32.totalorder %s503_s4, %s766_s16 }
  0x38   : > { %p511_p4 = por %p510_p6, %p509_p3 }
  0x39   : > { %p507_p13 = pneg %p506_p11 }
  0x3a   : > { %p513_p12 = por %p512_p10, %p511_p4 }
  0x3c   : > { %p514_p1 = pnand %p513_p12, %p507_p13 }
  0x3e   : > { %517 = shalt.err (!%p514_p1)
}
  0x3f   : > { %s518_s25 = scalar_lea.vmem %s165_s19, 128  ;;  %s622_s26 = smov [#allocation5]  }
  0x40   : > { %p519_p2 = scmp.ne.s32.totalorder %s165_s19, %s518_s25  ;;  %s523_s3 = sshll.u32 %s622_s26, 4  ;;  %s524_s3 = int_to_ptr.vmem [resolvable:$false] %s523_s3 }
  0x41   : > { %s525_s8 = scalar_lea.vmem %s524_s3, 256  ;;  %p526_p8 = scmp.lt.s32.totalorder %s165_s19, %s524_s3 }
  0x42   : > { %p521_p9 = pnand %p519_p2, %p475_p5  ;;  %p527_p7 = scmp.lt.s32.totalorder %s525_s8, %s518_s25 }
  0x44   : > { %p522_p11 = pneg %p521_p9  ;;  %p528_p3 = por %p527_p7, %p526_p8 }
  0x46   : > { %p529_p6 = pnand %p528_p3, %p522_p11 }
  0x48   : > { %532 = shalt.err (!%p529_p6)
}
  0x49   : > { %409 = dma.hbm_to_vmem [thread:$0]  (!%p721_p0), %s766_s16, 128, %s165_s19, %s153_s30  }
  0x4a   : > { %p877_p13 = scmp.ne.s32.totalorder %s876_s7, 0 }
  0x4b   : > { %s793_s15 = sand.u32 (!%p877_p13), 1, %s603_s10   ;;  %p878_p8 = scmp.ne.s32.totalorder (!%p877_p13), %s870_s21, 0 }
  0x4c   : > { %173 = sbr.rel (%p877_p13) target bundleno = 157 (0x9d), region = 28  ;;  %s796_s18 = sshll.u32 (!%p877_p13), %s793_s15, 3 }
  0x4d   : > { %s176_s4 = scalar_lea.sflag (!%p877_p13), [#allocation3], %s793_s15  ;;  %s179_s6 = scalar_lea.vmem (!%p877_p13), [#allocation2], %s796_s18 }
  0x53   : > { %586 = dma.done.wait (%p878_p8), %s176_s4, 128  }
  0x54   : > { %588 = vsyncadd (%p878_p8), %s176_s4, 4294967168  ;;  %s185_s5 = scalar_lea.sflag [#allocation6], %s793_s15  ;;  %s188_s7 = scalar_lea.vmem [#allocation5], %s796_s18 }
  0x55   : > { %590 = dma.done.wait (%p878_p8), %s185_s5, 128  }
  0x56   : > { %592 = vsyncadd (%p878_p8), %s185_s5, 4294967168  ;;  %v221_v0 = vld [vmem:[%s179_s6] sm:$0xff]  ;;  %v222_v7 = vld [vmem:[%s188_s7] sm:$0xff]  ;;  %s394_s21 = sshll.u32 %s611_s12, 7  ;;  %s213_s16 = scalar_lea.vmem [#allocation7], %s796_s18 }
  0x57   : > { %v223_v1 = vand.u32 2147483647, %v221_v0  ;;  %vm243_vm0 = vcmp.ge.f32.partialorder %v221_v0, 0.0  ;;  %v227_v16 = vmax.f32 %v221_v0, 0.0  ;;  %v228_v17 = vmul.f32 %v222_v7, %v221_v0  ;;  %s278_s19 = sshll.u32 %s213_s16, 4  ;;  %s815_s27 = scalar_lea.hbm %s866_s2, %s394_s21  ;;  %s817_s19 = int_to_ptr.vmem [resolvable:$true] %s278_s19 }
  0x58   : > { %v246_v21 = vmul.f32 -0.5, %v222_v7  ;;  %s265_s28 = scalar_lea.sflag [#allocation4], %s793_s15  ;;  %s533_s29 = scalar_lea.vmem %s817_s19, 128 }
  0x59   : > { %v224_v2 = vsub.f32 0.0, %v223_v1  ;;  %v229_v20 = vsub.f32 %v227_v16, %v228_v17  ;;  %p534_p0 = scmp.ne.s32.totalorder %s817_s19, %s533_s29  ;;  %p879_p5 = scmp.ne.s32.totalorder %s871_s22, 0 }
  0x5a   : > { %v247_v24 = vadd.f32 0.75, %v246_v21  ;;  %s623_s12 = smov [#allocation7]  }
  0x5b   : > { %v225_v3 = vmul.f32 1.442695, %v224_v2  ;;  %p535_p7 = pnand %p534_p0, %p879_p5  ;;  %s537_s25 = sshll.u32 %s623_s12, 4  ;;  %s538_s25 = int_to_ptr.vmem [resolvable:$false] %s537_s25 }
  0x5c   : > { %s539_s26 = scalar_lea.vmem %s538_s25, 256  ;;  %p540_p10 = scmp.lt.s32.totalorder %s817_s19, %s538_s25 }
  0x5d   : > { %465 = vpow2.f32 %v225_v3  ;;  %p536_p4 = pneg %p535_p7  ;;  %p541_p12 = scmp.lt.s32.totalorder %s539_s26, %s533_s29 }
  0x5f   : > { %p542_p1 = por %p541_p12, %p540_p10 }
  0x61   : > { %p543_p2 = pnand %p542_p1, %p536_p4 }
  0x67   : > { %v466_v4 = vpop.eup %465 }
  0x68   : > { %v230_v5 = vadd.f32 1.0, %v466_v4  ;;  %v233_v9 = vmul.f32 -0.5, %v466_v4  ;;  %v236_v15 = vand.u32 2147483647, %v466_v4 }
  0x6a   : > { %467 = vrcp.f32 %v230_v5  ;;  %v234_v12 = vadd.f32 1.0, %v233_v9  ;;  %vm237_vm1 = vcmp.lt.f32.partialorder %v236_v15, 0.0004427343 }
  0x6b   : > { %469 = vlog2.f32 %v230_v5 }
  0x6c   : > { %v235_v19 = vmul.f32 %v466_v4, %v234_v12 }
  0x74   : > { %v468_v6 = vpop.eup %467 }
  0x75   : > { %v244_v8 = vmul.f32 %v468_v6, %v466_v4  ;;  %v470_v14 = vpop.eup %469 }
  0x76   : > { %v232_v18 = vmul.f32 0.6931472, %v470_v14 }
  0x77   : > { %v245_v10 = vsel %vm243_vm0, %v468_v6, %v244_v8 }
  0x78   : > { %v248_v11 = vsub.f32 %v222_v7, %v245_v10  ;;  %v238_v22 = vsel %vm237_vm1, %v235_v19, %v232_v18 }
  0x79   : > { %v239_v23 = vadd.f32 %v238_v22, %v229_v20 }
  0x7a   : > { %v249_v13 = vand.u32 2147483647, %v248_v11 }
  0x7b   : > { %v258_v29 = vmul.f32 %v247_v24, %v239_v23 }
  0x7c   : > { %471 = vrsqrt.f32 %v249_v13  ;;  %vm252_vm2 = vcmp.eq.f32.partialorder %v249_v13, inf  ;;  %v255_v26 = vand.u32 2147483648, %v249_v13  ;;  %vm254_vm3 = vcmp.eq.f32.partialorder %v249_v13, 0.0 }
  0x86   : > { %v472_v25 = vpop.eup %471 }
  0x87   : > { %v251_v27 = vmul.f32 %v472_v25, %v249_v13 }
  0x89   : > { %v253_v28 = vsel %vm252_vm2, %v249_v13, %v251_v27 }
  0x8a   : > { %v256_v30 = vsel %vm254_vm3, %v255_v26, %v253_v28 }
  0x8b   : > { %v257_v31 = vmul.f32 %v256_v30, %v249_v13 }
  0x8d   : > { %v259_v32 = vmul.f32 %v258_v29, %v257_v31 }
  0x8f   : > { %263 = vst [vmem:[%s213_s16] sm:$0xff] %v259_v32 }
  0x90   : > { %546 = shalt.err (!%p543_p2)
}
  0x91   : > { %s547_s3 = scalar_lea.hbm %s815_s27, 128  ;;  %s551_s18 = scalar_lea.hbm %s866_s2, 256 }
  0x92   : > { %p548_p9 = scmp.ne.s32.totalorder %s815_s27, %s547_s3  ;;  %p552_p6 = scmp.lt.u32.totalorder %s815_s27, %s866_s2 }
  0x93   : > { %p553_p13 = scmp.lt.u32.totalorder %s551_s18, %s547_s3  ;;  %p555_p0 = scmp.lt.u32.totalorder %s547_s3, %s815_s27 }
  0x94   : > { %p549_p11 = pnand %p548_p9, %p879_p5 }
  0x95   : > { %p554_p8 = por %p553_p13, %p552_p6 }
  0x96   : > { %p550_p3 = pneg %p549_p11 }
  0x97   : > { %p556_p7 = por %p555_p0, %p554_p8 }
  0x99   : > { %p557_p4 = pnand %p556_p7, %p550_p3 }
  0x9b   : > { %560 = shalt.err (!%p557_p4)
}
  0x9c   : > { %401 = dma.vmem_to_hbm [thread:$0]  (%p879_p5), %s817_s19, 128, %s815_s27, %s265_s28  }
  0x9d PF: > { %s290_s5 = sand.u32 1, %s599_s9   ;;  %p880_p10 = scmp.ne.s32.totalorder %s872_s24, 0 }
  0x9e   : > { %p881_p12 = scmp.ge.s32.totalorder %s619_s14, 2  ;;  %s291_s7 = scalar_lea.sflag [#allocation4], %s290_s5 }
  0xa0   : > { %p411_p1 = pnand %p881_p12, %p880_p10 }
  0xa2   : > { %594 = dma.done.wait (!%p411_p1), %s291_s7, 128  }
  0xa3   : > { %596 = vsyncadd (!%p411_p1), %s291_s7, 4294967168  ;;  %s21_s14 = sadd.s32 1, %s619_s14   ;;  %s882_s9 = smov %s603_s10 }
  0xa4   : > { %p18_p2 = scmp.ge.s32.totalorder %s21_s14, 4   ;;  %s883_s10 = smov %s607_s11 }
  0xa5   : > { %s884_s11 = smov %s695_s23  ;;  %s885_s12 = smov %s615_s13 }
  0xa6   : > { %s886_s13 = smov %s888_s17  ;;  %20 = sbr.rel (!%p18_p2) target bundleno = 8 (0x8), region = 90 }
  0xad   :  { %296 = vsyncpa [#allocation3], 1 }
  0xae   :  { %298 = vsyncpa [#allocation3 + $0x1], 1 }
  0xaf   :  { %299 = vsyncpa [#allocation6], 1 }
  0xb0   :  { %301 = vsyncpa [#allocation6 + $0x1], 1 }
  0xb1   :  { %302 = vsyncpa [#allocation4], 1 }
  0xb2   :  { %304 = vsyncpa [#allocation4 + $0x1], 1 }

</bundles_post_ra>
